<compile_context>
chip_gen: v7x
topology: tpu7x:2x2x1
jax: 0.10.0
libtpu: 0.0.40
codegen_flags: <defaults>
</compile_context>

<pallas_src>
import functools

import jax
import jax.numpy as jnp
from jax.experimental import pallas as pl
from jax.experimental.pallas import tpu as pltpu

_LANE = 128
_SUBLANE = 8
_NUM_SHARDS = 2          # leading "parallel" grid axis; uses both TCs on v7x
_MAX_BLOCK_ROWS = 4096   # (4096,128) f32 = 2 MiB/block; 2 inputs x 2 buffers = 8 MiB VMEM


def _wbce_kernel(x_ref, t_ref, bce_out, t_out, *, block_rows, tail_rows):
    """Accumulates per-shard (8,128) partial sums of the (un-negated) BCE term and of t."""
    i = pl.program_id(1)

    @pl.when(i == 0)
    def _init():
        bce_out[...] = jnp.zeros_like(bce_out)
        t_out[...] = jnp.zeros_like(t_out)

    def accumulate(x, t):
        # nn.BCELoss clamps the log terms at -100 (PyTorch behavior).
        log_x = jnp.maximum(jnp.log(x), -100.0)
        log_1mx = jnp.maximum(jnp.log(1.0 - x), -100.0)
        # Blend form of t*log_x + (1-t)*log_1mx (one fewer multiply); the
        # negation is applied once in the wrapper, not per element.
        term = log_1mx + t * (log_x - log_1mx)
        g = block_rows // _SUBLANE
        bce_out[...] += term.reshape(g, _SUBLANE, _LANE).sum(axis=0)
        t_out[...] += t.reshape(g, _SUBLANE, _LANE).sum(axis=0)

    if tail_rows == block_rows:
        # Every block is fully covered by (possibly zero-padded) data: padded
        # elements (x=0, t=0) contribute exactly 0 to both sums, so no mask.
        accumulate(x_ref[...].astype(jnp.float32),
                   t_ref[...].astype(jnp.float32))
    else:
        last = pl.num_programs(1) - 1

        @pl.when(i != last)
        def _steady():
            accumulate(x_ref[...].astype(jnp.float32),
                       t_ref[...].astype(jnp.float32))

        @pl.when(i == last)
        def _tail():
            # Ragged last block of this shard: rows >= tail_rows are
            # out-of-bounds garbage.  Mask BEFORE the logs so NaN/Inf garbage
            # cannot poison the accumulators; (x=0, t=0) contributes exactly 0.
            row = jax.lax.broadcasted_iota(jnp.int32, (block_rows, _LANE), 0)
            valid = row < tail_rows
            x = jnp.where(valid, x_ref[...].astype(jnp.float32), 0.0)
            t = jnp.where(valid, t_ref[...].astype(jnp.float32), 0.0)
            accumulate(x, t)


def weighted_bce_loss(inputs, targets, weight_fp=1.0, weight_fn=1.0):
    """Pallas TPU implementation of WeightedBCELoss.forward."""
    assert inputs.shape == targets.shape
    total_n = int(inputs.size)

    # Keep input dtype (bf16 inputs stay bf16 in HBM; cast happens in-kernel).
    x = jnp.ravel(inputs)
    t = jnp.ravel(targets)

    # Pad (only when needed) so the flat array reshapes to
    # (NUM_SHARDS, shard_rows, 128) with shard_rows a multiple of 8.  Zero
    # padding is exact: (x=0, t=0) -> BCE term 0 after the clamp, t-sum 0.
    unit = _NUM_SHARDS * _SUBLANE
    rows_raw = pl.cdiv(total_n, _LANE)
    rows = max(pl.cdiv(rows_raw, unit) * unit, unit)
    pad = rows * _LANE - total_n
    if pad:
        x = jnp.pad(x, (0, pad))
        t = jnp.pad(t, (0, pad))

    shard_rows = rows // _NUM_SHARDS
    block_rows = min(_MAX_BLOCK_ROWS, shard_rows)   # multiple of 8
    steps = pl.cdiv(shard_rows, block_rows)
    tail_rows = shard_rows - (steps - 1) * block_rows  # valid rows in last block

    x3 = x.reshape(_NUM_SHARDS, shard_rows, _LANE)
    t3 = t.reshape(_NUM_SHARDS, shard_rows, _LANE)

    in_spec = pl.BlockSpec((None, block_rows, _LANE), lambda c, i: (c, i, 0))
    out_spec = pl.BlockSpec((None, _SUBLANE, _LANE), lambda c, i: (c, 0, 0))

    kernel = functools.partial(
        _wbce_kernel, block_rows=block_rows, tail_rows=tail_rows)

    bce_part, t_part = pl.pallas_call(
        kernel,
        out_shape=(
            jax.ShapeDtypeStruct((_NUM_SHARDS, _SUBLANE, _LANE), jnp.float32),
            jax.ShapeDtypeStruct((_NUM_SHARDS, _SUBLANE, _LANE), jnp.float32),
        ),
        grid_spec=pltpu.PrefetchScalarGridSpec(
            num_scalar_prefetch=0,
            grid=(_NUM_SHARDS, steps),
            in_specs=[in_spec, in_spec],
            out_specs=(out_spec, out_spec),
        ),
        compiler_params=pltpu.CompilerParams(
            dimension_semantics=("parallel", "arbitrary"),
            vmem_limit_bytes=32 * 1024 * 1024,
        ),
    )(x3, t3)

    # Tiny final combine (2*8*128 elements per partial) in the wrapper; also
    # merges the two per-core partials on v7x.
    n = jnp.float32(total_n)
    mean_bce = -jnp.sum(bce_part) / n          # negate once here
    mean_t = jnp.sum(t_part) / n
    # mean(t*weight_fn + (1-t)*weight_fp) == weight_fp + (weight_fn - weight_fp)*mean(t)
    mean_w = float(weight_fp) + (float(weight_fn) - float(weight_fp)) * mean_t
    return mean_bce * mean_w


def _reference(inputs, targets, weight_fp=1.0, weight_fn=1.0):
    # Pure-JAX reference mirroring PyTorch semantics, for a sanity check.
    x = inputs.astype(jnp.float32)
    t = targets.astype(jnp.float32)
    log_x = jnp.maximum(jnp.log(x), -100.0)
    log_1mx = jnp.maximum(jnp.log(1.0 - x), -100.0)
    s = jnp.mean(-(t * log_x + (1.0 - t) * log_1mx))
    loss = t * weight_fn * s + (1.0 - t) * weight_fp * s
    return jnp.mean(loss)


if __name__ == "__main__":
    key = jax.random.PRNGKey(0)
    k1, k2, k3, k4 = jax.random.split(key, 4)

    weight_fp, weight_fn = 2.0, 3.0  # deterministic "parameters" from __init__

    # Small shape consistent with the module's usage (probabilities + binary targets).
    shape = (2, 4, 16, 16)
    inputs = jax.nn.sigmoid(jax.random.normal(k1, shape, dtype=jnp.float32))
    targets = (jax.random.uniform(k2, shape) > 0.5).astype(jnp.float32)

    out = weighted_bce_loss(inputs, targets, weight_fp, weight_fn)
    out = jax.block_until_ready(out)
    ref = _reference(inputs, targets, weight_fp, weight_fn)
    # Tolerance covers reduction-order / transcendental-lowering differences
    # between the Pallas kernel and the XLA reference.
    assert jnp.allclose(out, ref, rtol=5e-4, atol=1e-6), (out, ref)

    # Ragged case: N not a multiple of 128 exercises the zero-padding path.
    shape2 = (2, 3, 15, 15)
    inputs2 = jax.nn.sigmoid(jax.random.normal(k3, shape2, dtype=jnp.float32))
    targets2 = (jax.random.uniform(k4, shape2) > 0.5).astype(jnp.float32)
    out2 = jax.block_until_ready(
        weighted_bce_loss(inputs2, targets2, weight_fp, weight_fn))
    ref2 = _reference(inputs2, targets2, weight_fp, weight_fn)
    assert jnp.allclose(out2, ref2, rtol=5e-4, atol=1e-6), (out2, ref2)

    print("KERNEL_OK")
</pallas_src>

<mosaic_0001>
module attributes {stable_mosaic.version = 11 : i64} {
  func.func @_wbce_kernel(%arg0: i32, %arg1: i32, %arg2: memref<1x8x128xf32, #tpu.memory_space<vmem>>, %arg3: memref<1x8x128xf32, #tpu.memory_space<vmem>>, %arg4: memref<1x8x128xf32, #tpu.memory_space<vmem>>, %arg5: memref<1x8x128xf32, #tpu.memory_space<vmem>>) attributes {dimension_semantics = [#tpu.dimension_semantics<parallel>, #tpu.dimension_semantics<arbitrary>], iteration_bounds = array<i64: 2, 1>, scalar_prefetch = 0 : i64, scratch_operands = 0 : i64, tpu.core_type = #tpu.core_type<tc>, window_params = [{transform_indices = @transform_0, window_bounds = array<i64: 1, 8, 128>}, {transform_indices = @transform_1, window_bounds = array<i64: 1, 8, 128>}, {transform_indices = @transform_2, window_bounds = array<i64: 1, 8, 128>}, {transform_indices = @transform_3, window_bounds = array<i64: 1, 8, 128>}]} {
    %c0_i32 = arith.constant 0 : i32
    %0 = arith.cmpi eq, %arg1, %c0_i32 : i32
    %1 = arith.extui %0 : i1 to i32
    %c0_i32_0 = arith.constant 0 : i32
    %2 = arith.cmpi ne, %1, %c0_i32_0 : i32
    scf.if %2 {
      %cst_22 = arith.constant 0.000000e+00 : f32
      %34 = vector.broadcast %cst_22 : f32 to vector<8x128xf32>
      %c0_23 = arith.constant 0 : index
      %c0_24 = arith.constant 0 : index
      %c0_25 = arith.constant 0 : index
      %35 = vector.load %arg4[%c0_23, %c0_24, %c0_25] : memref<1x8x128xf32, #tpu.memory_space<vmem>>, vector<1x8x128xf32>
      %36 = vector.shape_cast %35 : vector<1x8x128xf32> to vector<8x128xf32>
      %37 = vector.shape_cast %34 : vector<8x128xf32> to vector<1x8x128xf32>
      tpu.vector_store %arg4[%c0_23, %c0_24, %c0_25], %37 {strides = array<i32>} : memref<1x8x128xf32, #tpu.memory_space<vmem>>, vector<1x8x128xf32>,
      %cst_26 = arith.constant 0.000000e+00 : f32
      %38 = vector.broadcast %cst_26 : f32 to vector<8x128xf32>
      %c0_27 = arith.constant 0 : index
      %c0_28 = arith.constant 0 : index
      %c0_29 = arith.constant 0 : index
      %39 = vector.load %arg5[%c0_27, %c0_28, %c0_29] : memref<1x8x128xf32, #tpu.memory_space<vmem>>, vector<1x8x128xf32>
      %40 = vector.shape_cast %39 : vector<1x8x128xf32> to vector<8x128xf32>
      %41 = vector.shape_cast %38 : vector<8x128xf32> to vector<1x8x128xf32>
      tpu.vector_store %arg5[%c0_27, %c0_28, %c0_29], %41 {strides = array<i32>} : memref<1x8x128xf32, #tpu.memory_space<vmem>>, vector<1x8x128xf32>,
    } else {
    }
    %c0 = arith.constant 0 : index
    %c0_1 = arith.constant 0 : index
    %c0_2 = arith.constant 0 : index
    %3 = vector.load %arg2[%c0, %c0_1, %c0_2] : memref<1x8x128xf32, #tpu.memory_space<vmem>>, vector<1x8x128xf32>
    %4 = vector.shape_cast %3 : vector<1x8x128xf32> to vector<8x128xf32>
    %c0_3 = arith.constant 0 : index
    %c0_4 = arith.constant 0 : index
    %c0_5 = arith.constant 0 : index
    %5 = vector.load %arg3[%c0_3, %c0_4, %c0_5] : memref<1x8x128xf32, #tpu.memory_space<vmem>>, vector<1x8x128xf32>
    %6 = vector.shape_cast %5 : vector<1x8x128xf32> to vector<8x128xf32>
    %7 = math.log %4 : vector<8x128xf32>
    %cst = arith.constant -1.000000e+02 : f32
    %8 = vector.broadcast %cst : f32 to vector<8x128xf32>
    %9 = arith.maximumf %7, %8 : vector<8x128xf32>
    %cst_6 = arith.constant 1.000000e+00 : f32
    %10 = vector.broadcast %cst_6 : f32 to vector<8x128xf32>
    %11 = arith.subf %10, %4 : vector<8x128xf32>
    %12 = math.log %11 : vector<8x128xf32>
    %cst_7 = arith.constant -1.000000e+02 : f32
    %13 = vector.broadcast %cst_7 : f32 to vector<8x128xf32>
    %14 = arith.maximumf %12, %13 : vector<8x128xf32>
    %15 = arith.subf %9, %14 : vector<8x128xf32>
    %16 = arith.mulf %6, %15 : vector<8x128xf32>
    %17 = arith.addf %14, %16 : vector<8x128xf32>
    %c0_8 = arith.constant 0 : index
    %c0_9 = arith.constant 0 : index
    %c0_10 = arith.constant 0 : index
    %18 = vector.load %arg4[%c0_8, %c0_9, %c0_10] : memref<1x8x128xf32, #tpu.memory_space<vmem>>, vector<1x8x128xf32>
    %19 = vector.shape_cast %18 : vector<1x8x128xf32> to vector<8x128xf32>
    %20 = vector.shape_cast %17 : vector<8x128xf32> to vector<1x8x128xf32>
    %cst_11 = arith.constant dense<0.000000e+00> : vector<8x128xf32>
    %21 = vector.multi_reduction <add>, %20, %cst_11 [0] : vector<1x8x128xf32> to vector<8x128xf32>
    %22 = arith.addf %19, %21 : vector<8x128xf32>
    %c0_12 = arith.constant 0 : index
    %c0_13 = arith.constant 0 : index
    %c0_14 = arith.constant 0 : index
    %23 = vector.load %arg4[%c0_12, %c0_13, %c0_14] : memref<1x8x128xf32, #tpu.memory_space<vmem>>, vector<1x8x128xf32>
    %24 = vector.shape_cast %23 : vector<1x8x128xf32> to vector<8x128xf32>
    %25 = vector.shape_cast %22 : vector<8x128xf32> to vector<1x8x128xf32>
    tpu.vector_store %arg4[%c0_12, %c0_13, %c0_14], %25 {strides = array<i32>} : memref<1x8x128xf32, #tpu.memory_space<vmem>>, vector<1x8x128xf32>,
    %c0_15 = arith.constant 0 : index
    %c0_16 = arith.constant 0 : index
    %c0_17 = arith.constant 0 : index
    %26 = vector.load %arg5[%c0_15, %c0_16, %c0_17] : memref<1x8x128xf32, #tpu.memory_space<vmem>>, vector<1x8x128xf32>
    %27 = vector.shape_cast %26 : vector<1x8x128xf32> to vector<8x128xf32>
    %28 = vector.shape_cast %6 : vector<8x128xf32> to vector<1x8x128xf32>
    %cst_18 = arith.constant dense<0.000000e+00> : vector<8x128xf32>
    %29 = vector.multi_reduction <add>, %28, %cst_18 [0] : vector<1x8x128xf32> to vector<8x128xf32>
    %30 = arith.addf %27, %29 : vector<8x128xf32>
    %c0_19 = arith.constant 0 : index
    %c0_20 = arith.constant 0 : index
    %c0_21 = arith.constant 0 : index
    %31 = vector.load %arg5[%c0_19, %c0_20, %c0_21] : memref<1x8x128xf32, #tpu.memory_space<vmem>>, vector<1x8x128xf32>
    %32 = vector.shape_cast %31 : vector<1x8x128xf32> to vector<8x128xf32>
    %33 = vector.shape_cast %30 : vector<8x128xf32> to vector<1x8x128xf32>
    tpu.vector_store %arg5[%c0_19, %c0_20, %c0_21], %33 {strides = array<i32>} : memref<1x8x128xf32, #tpu.memory_space<vmem>>, vector<1x8x128xf32>,
    return
  }
  func.func @transform_0(%arg0: i32, %arg1: i32) -> (i32, i32, i32) {
    %c0_i32 = arith.constant 0 : i32
    %c0_i32_0 = arith.constant 0 : i32
    return %arg0, %arg1, %c0_i32 : i32, i32, i32
  }
  func.func @transform_1(%arg0: i32, %arg1: i32) -> (i32, i32, i32) {
    %c0_i32 = arith.constant 0 : i32
    %c0_i32_0 = arith.constant 0 : i32
    return %arg0, %arg1, %c0_i32 : i32, i32, i32
  }
  func.func @transform_2(%arg0: i32, %arg1: i32) -> (i32, i32, i32) {
    %c0_i32 = arith.constant 0 : i32
    %c0_i32_0 = arith.constant 0 : i32
    %c0_i32_1 = arith.constant 0 : i32
    return %arg0, %c0_i32, %c0_i32_0 : i32, i32, i32
  }
  func.func @transform_3(%arg0: i32, %arg1: i32) -> (i32, i32, i32) {
    %c0_i32 = arith.constant 0 : i32
    %c0_i32_0 = arith.constant 0 : i32
    %c0_i32_1 = arith.constant 0 : i32
    return %arg0, %c0_i32, %c0_i32_0 : i32, i32, i32
  }
}

</mosaic_0001>

<bundles_post_ra>
// kernel: tpu_custom_call.1
= control target key start
LH: loop header
LB: loop body
LE: loop exit
PB: predicated region body
PF: predicated region fallthrough
CT: control target
= control target key end

     0   :  { %9 = vsyncpa [#allocation3], 0  ;;  %s1004_s0 = inlined_call_operand.hbm [shape: f32[2,8,128], index: 0, kind: input, shape index: {}]   ;;  %s1005_s1 = inlined_call_operand.hbm [shape: f32[2,8,128], index: 1, kind: input, shape index: {}]   ;;  %s1006_s2 = inlined_call_operand.hbm [shape: f32[2,8,128], index: 2, kind: output, shape index: {0}]   ;;  %s1007_s3 = inlined_call_operand.hbm [shape: f32[2,8,128], index: 3, kind: output, shape index: {1}]  }
   0x1   :  { %11 = vsyncpa [#allocation3 + $0x1], 0 }
   0x2   :  { %12 = vsyncpa [#allocation6], 0 }
   0x3   :  { %14 = vsyncpa [#allocation6 + $0x1], 0 }
   0x4   :  { %15 = vsyncpa [#allocation4], 0 }
   0x5   :  { %17 = vsyncpa [#allocation4 + $0x1], 0 }
   0x6   :  { %18 = vsyncpa [#allocation9], 0 }
   0x7   :  { %20 = vsyncpa [#allocation9 + $0x1], 0  ;;  %s745_s12 = smov 0   ;;  %s747_s13 = smov 0  }
   0x8   :  { %s749_s14 = smov 0   ;;  %s751_s15 = smov 0  }
   0x9   :  { %s753_s16 = smov 0   ;;  %s755_s17 = smov 0  }
   0xa LB: > { %s445_s18 = sadd.s32 4294967295, %s719_s17   ;;  %s446_s19 = sadd.s32 4294967294, %s719_s17   ;;  %s719_s17 = sphi %s755_s17, %s26_s17   ;;  %s715_s16 = sphi %s753_s16, %s1027_s16   ;;  %s711_s15 = sphi %s751_s15, %s1026_s15   ;;  %s707_s14 = sphi %s749_s14, %s1025_s14   ;;  %s703_s13 = sphi %s747_s13, %s1024_s13   ;;  %s699_s12 = sphi %s745_s12, %s1023_s12  }
   0xb   : > { %s38_s20 = sadd.s32 1, %s715_s16  ;;  %s47_s21 = sadd.s32 1, %s707_s14 }
   0xc   : > { %p40_p0 = scmp.ge.s32.totalorder %s38_s20, 2  ;;  %p54_p1 = scmp.ne.s32.totalorder %s707_s14, %s703_s13 }
   0xd   : > { %p55_p2 = scmp.eq.s32.totalorder %s719_s17, 0  ;;  %p60_p3 = scmp.ne.s32.totalorder %s703_s13, %s699_s12 }
   0xe   : > { %s1029_s20 = smov (%p40_p0, %s38_s20), 0  ;;  %p61_p5 = scmp.eq.s32.totalorder %s445_s18, 0 }
   0xf   : > { %p786_p4 = por %p55_p2, %p54_p1  ;;  %s42_s23 = ssub.s32 %s715_s16, %s1029_s20 }
  0x10   : > { %p112_p6 = scmp.eq.s32.totalorder %s445_s18, 1  ;;  %p45_p7 = scmp.eq.s32.totalorder %s42_s23, 0 }
  0x11   : > { %p792_p8 = por %p61_p5, %p60_p3  ;;  %p118_p10 = scmp.eq.s32.totalorder %s446_s19, 1 }
  0x12   : > { %p796_p9 = por %p112_p6, %p54_p1  ;;  %p486_p13 = scmp.lt.s32.totalorder %s719_s17, 2 }
  0x13   : > { %s1011_s24 = scalar_select %p792_p8, 1, 0 }
  0x14   : > { %s1012_s25 = scalar_select %p796_p9, 1, 0 }
  0x15   : > { %s801_s26 = scalar_select %p45_p7, %s707_s14, %s47_s21  }
  0x16   : > { %p803_p11 = por %p118_p10, %p60_p3  ;;  %s810_s28 = sand.u32 1, %s707_s14  }
  0x17   : > { %s449_s29 = sshll.u32 %s810_s28, 3  ;;  %s450_s30 = sshll.u32 %s715_s16, 7 }
  0x18   : > { %s1013_s27 = scalar_select %p803_p11, 1, 0 }
  0x19   : > { %s819_s6 = scalar_lea.hbm %s1004_s0, %s450_s30  ;;  %s168_s7 = scalar_lea.vmem [#allocation2], %s449_s29 }
  0x1a   : > { %s176_s8 = sshll.u32 %s168_s7, 4  ;;  %p827_p0 = pnand %p486_p13, %p786_p4  ;;  %s823_s8 = int_to_ptr.vmem [resolvable:$true] %s176_s8 }
  0x1b   : > { %s165_s10 = scalar_lea.sflag [#allocation3], %s810_s28  ;;  %s541_s11 = scalar_lea.hbm %s819_s6, 128 }
  0x1c   : > { %p542_p3 = scmp.ne.s32.totalorder %s819_s6, %s541_s11  ;;  %p543_p5 = pneg %p827_p0 }
  0x1d   : > { %s546_s21 = scalar_lea.hbm %s1004_s0, 256  ;;  %p547_p4 = scmp.lt.u32.totalorder %s819_s6, %s1004_s0 }
  0x1e   : > { %p544_p6 = pnand %p543_p5, %p542_p3  ;;  %p548_p10 = scmp.lt.u32.totalorder %s546_s21, %s541_s11 }
  0x1f   : > { %p550_p12 = scmp.lt.u32.totalorder %s541_s11, %s819_s6 }
  0x20   : > { %p545_p7 = pneg %p544_p6  ;;  %p549_p13 = por %p548_p10, %p547_p4 }
  0x22   : > { %p551_p1 = por %p550_p12, %p549_p13 }
  0x24   : > { %p552_p2 = pnand %p551_p1, %p545_p7 }
  0x26   : > { %555 = shalt.err (!%p552_p2)
}
  0x27   : > { %s556_s4 = scalar_lea.vmem %s823_s8, 128  ;;  %s721_s5 = smov [#allocation2]  }
  0x28   : > { %p557_p3 = scmp.ne.s32.totalorder %s823_s8, %s556_s4  ;;  %s561_s7 = sshll.u32 %s721_s5, 4  ;;  %s562_s7 = int_to_ptr.vmem [resolvable:$false] %s561_s7 }
  0x29   : > { %s563_s18 = scalar_lea.vmem %s562_s7, 256  ;;  %p564_p9 = scmp.lt.s32.totalorder %s823_s8, %s562_s7 }
  0x2a   : > { %p559_p6 = pnand %p557_p3, %p543_p5  ;;  %p565_p4 = scmp.lt.s32.totalorder %s563_s18, %s556_s4 }
  0x2c   : > { %p560_p11 = pneg %p559_p6  ;;  %p566_p10 = por %p565_p4, %p564_p9 }
  0x2e   : > { %p567_p12 = pnand %p566_p10, %p560_p11 }
  0x30   : > { %570 = shalt.err (!%p567_p12)
}
  0x31   : > { %475 = dma.hbm_to_vmem [thread:$0]  (!%p827_p0), %s819_s6, 128, %s823_s8, %s165_s10  }
  0x32   : > { %p1015_p1 = scmp.lt.s32.totalorder %s719_s17, 3  ;;  %p1016_p2 = scmp.ge.s32.totalorder %s719_s17, 1 }
  0x33   : > { %s872_s22 = scalar_lea.hbm %s1005_s1, %s450_s30  ;;  %s187_s23 = scalar_lea.vmem [#allocation5], %s449_s29 }
  0x34   : > { %p863_p7 = pnand %p1016_p2, %p1015_p1  ;;  %s195_s4 = sshll.u32 %s187_s23, 4  ;;  %s196_s4 = int_to_ptr.vmem [resolvable:$true] %s195_s4 }
  0x35   : > { %s184_s6 = scalar_lea.sflag [#allocation6], %s810_s28  ;;  %s571_s8 = scalar_lea.hbm %s872_s22, 128 }
  0x36   : > { %s1017_s11 = scalar_select %p863_p7, 1, 0 }
  0x37   : > { %p572_p9 = scmp.ne.s32.totalorder %s872_s22, %s571_s8  ;;  %s576_s30 = scalar_lea.hbm %s1005_s1, 256 }
  0x38   : > { %p577_p3 = scmp.lt.u32.totalorder %s872_s22, %s1005_s1  ;;  %p578_p6 = scmp.lt.u32.totalorder %s576_s30, %s571_s8 }
  0x39   : > { %p574_p11 = pnand %p572_p9, %p543_p5  ;;  %p580_p10 = scmp.lt.u32.totalorder %s571_s8, %s872_s22 }
  0x3a   : > { %p579_p4 = por %p578_p6, %p577_p3 }
  0x3b   : > { %p575_p13 = pneg %p574_p11 }
  0x3c   : > { %p581_p12 = por %p580_p10, %p579_p4 }
  0x3e   : > { %p582_p1 = pnand %p581_p12, %p575_p13 }
  0x40   : > { %585 = shalt.err (!%p582_p1)
}
  0x41   : > { %s586_s28 = scalar_lea.vmem %s196_s4, 128  ;;  %s722_s29 = smov [#allocation5]  }
  0x42   : > { %p587_p2 = scmp.ne.s32.totalorder %s196_s4, %s586_s28  ;;  %s591_s19 = sshll.u32 %s722_s29, 4  ;;  %s592_s19 = int_to_ptr.vmem [resolvable:$false] %s591_s19 }
  0x43   : > { %s593_s21 = scalar_lea.vmem %s592_s19, 256  ;;  %p594_p8 = scmp.lt.s32.totalorder %s196_s4, %s592_s19 }
  0x44   : > { %p589_p9 = pnand %p587_p2, %p543_p5  ;;  %p595_p7 = scmp.lt.s32.totalorder %s593_s21, %s586_s28 }
  0x46   : > { %p590_p11 = pneg %p589_p9  ;;  %p596_p3 = por %p595_p7, %p594_p8 }
  0x48   : > { %p597_p6 = pnand %p596_p3, %p590_p11 }
  0x4a   : > { %600 = shalt.err (!%p597_p6)
}
  0x4b   : > { %478 = dma.hbm_to_vmem [thread:$0]  (!%p827_p0), %s872_s22, 128, %s196_s4, %s184_s6  }
  0x4c   : > { %p1018_p13 = scmp.ne.s32.totalorder %s1017_s11, 0 }
  0x4d   : > { %s899_s23 = sand.u32 (!%p1018_p13), 1, %s703_s13   ;;  %p1019_p8 = scmp.ne.s32.totalorder (!%p1018_p13), %s1011_s24, 0 }
  0x4e   : > { %204 = sbr.rel (%p1018_p13) target bundleno = 139 (0x8b), region = 28  ;;  %s902_s8 = sshll.u32 (!%p1018_p13), %s899_s23, 3 }
  0x4f   : > { %s207_s10 = scalar_lea.sflag (!%p1018_p13), [#allocation3], %s899_s23  ;;  %s210_s5 = scalar_lea.vmem (!%p1018_p13), [#allocation2], %s902_s8 }
  0x55   : > { %682 = dma.done.wait (%p1019_p8), %s207_s10, 128  }
  0x56   : > { %684 = vsyncadd (%p1019_p8), %s207_s10, 4294967168  ;;  %s216_s9 = scalar_lea.sflag [#allocation6], %s899_s23  ;;  %s219_s11 = scalar_lea.vmem [#allocation5], %s902_s8 }
  0x57   : > { %686 = dma.done.wait (%p1019_p8), %s216_s9, 128  }
  0x58   : > { %688 = vsyncadd (%p1019_p8), %s216_s9, 4294967168  ;;  %s460_s22 = sshll.u32 %s711_s15, 7  ;;  %s251_s4 = scalar_lea.vmem [#allocation8], %s902_s8  ;;  %v258_v0 = vld [vmem:[%s210_s5] sm:$0xff]  ;;  %v259_v1 = vld [vmem:[%s219_s11] sm:$0xff] }
  0x59   : > { %s310_s6 = sshll.u32 %s251_s4, 4  ;;  %537 = vlog2.f32 %v258_v0  ;;  %v263_v2 = vsub.f32 1.0, %v258_v0  ;;  %s923_s18 = scalar_lea.hbm %s1007_s3, %s460_s22  ;;  %277 = vst [vmem:[%s251_s4] sm:$0xff] %v259_v1  ;;  %s925_s6 = int_to_ptr.vmem [resolvable:$true] %s310_s6 }
  0x5a   : > { %s284_s24 = scalar_lea.sflag [#allocation9], %s899_s23  ;;  %s601_s28 = scalar_lea.vmem %s925_s6, 128 }
  0x5b   : > { %539 = vlog2.f32 %v263_v2  ;;  %p602_p0 = scmp.ne.s32.totalorder %s925_s6, %s601_s28  ;;  %p1020_p5 = scmp.ne.s32.totalorder %s1012_s25, 0 }
  0x5c   : > { %s723_s29 = smov [#allocation8]  }
  0x5d   : > { %p603_p7 = pnand %p602_p0, %p1020_p5  ;;  %s605_s19 = sshll.u32 %s723_s29, 4  ;;  %s606_s19 = int_to_ptr.vmem [resolvable:$false] %s605_s19 }
  0x5e   : > { %s607_s21 = scalar_lea.vmem %s606_s19, 256  ;;  %p608_p10 = scmp.lt.s32.totalorder %s925_s6, %s606_s19 }
  0x5f   : > { %p604_p4 = pneg %p603_p7  ;;  %p609_p12 = scmp.lt.s32.totalorder %s607_s21, %s601_s28 }
  0x61   : > { %p610_p1 = por %p609_p12, %p608_p10 }
  0x63   : > { %p611_p2 = pnand %p610_p1, %p604_p4 }
  0x65   : > { %614 = shalt.err (!%p611_p2)
}
  0x66   : > { %s615_s10 = scalar_lea.hbm %s923_s18, 128  ;;  %s619_s11 = scalar_lea.hbm %s1007_s3, 256 }
  0x67   : > { %p616_p9 = scmp.ne.s32.totalorder %s923_s18, %s615_s10  ;;  %p620_p6 = scmp.lt.u32.totalorder %s923_s18, %s1007_s3 }
  0x68   : > { %p621_p13 = scmp.lt.u32.totalorder %s619_s11, %s615_s10  ;;  %p623_p0 = scmp.lt.u32.totalorder %s615_s10, %s923_s18 }
  0x69   : > { %p617_p11 = pnand %p616_p9, %p1020_p5 }
  0x6a   : > { %p622_p8 = por %p621_p13, %p620_p6 }
  0x6b   : > { %p618_p3 = pneg %p617_p11 }
  0x6c   : > { %p624_p7 = por %p623_p0, %p622_p8 }
  0x6e   : > { %p625_p4 = pnand %p624_p7, %p618_p3 }
  0x70   : > { %628 = shalt.err (!%p625_p4)
}
  0x71   : > { %469 = dma.vmem_to_hbm [thread:$0]  (%p1020_p5), %s925_s6, 128, %s923_s18, %s284_s24   ;;  %v538_v3 = vpop.eup %537 }
  0x72   : > { %v261_v4 = vmul.f32 0.6931472, %v538_v3  ;;  %v540_v5 = vpop.eup %539  ;;  %s244_s7 = scalar_lea.vmem [#allocation7], %s902_s8  ;;  %s955_s21 = scalar_lea.hbm %s1006_s2, %s460_s22 }
  0x73   : > { %v265_v7 = vmul.f32 0.6931472, %v540_v5  ;;  %s297_s28 = sshll.u32 %s244_s7, 4  ;;  %s279_s6 = scalar_lea.sflag [#allocation4], %s899_s23  ;;  %s957_s28 = int_to_ptr.vmem [resolvable:$true] %s297_s28 }
  0x74   : > { %v262_v6 = vmax.f32 %v261_v4, -100.0  ;;  %s629_s18 = scalar_lea.vmem %s957_s28, 128  ;;  %s724_s8 = smov [#allocation7]  }
  0x75   : > { %v266_v8 = vmax.f32 %v265_v7, -100.0  ;;  %p630_p10 = scmp.ne.s32.totalorder %s957_s28, %s629_s18  ;;  %s633_s24 = sshll.u32 %s724_s8, 4  ;;  %s634_s24 = int_to_ptr.vmem [resolvable:$false] %s633_s24 }
  0x76   : > { %s635_s15 = scalar_lea.vmem %s634_s24, 256  ;;  %p636_p2 = scmp.lt.s32.totalorder %s957_s28, %s634_s24 }
  0x77   : > { %v267_v9 = vsub.f32 %v262_v6, %v266_v8  ;;  %p631_p12 = pnand %p630_p10, %p1020_p5  ;;  %p637_p9 = scmp.lt.s32.totalorder %s635_s15, %s629_s18 }
  0x79   : > { %v268_v10 = vmul.f32 %v267_v9, %v259_v1  ;;  %p632_p1 = pneg %p631_p12  ;;  %p638_p11 = por %p637_p9, %p636_p2 }
  0x7b   : > { %v269_v11 = vadd.f32 %v268_v10, %v266_v8  ;;  %p639_p3 = pnand %p638_p11, %p632_p1 }
  0x7d   : > { %273 = vst [vmem:[%s244_s7] sm:$0xff] %v269_v11 }
  0x7e   : > { %642 = shalt.err (!%p639_p3)
}
  0x7f   : > { %s643_s23 = scalar_lea.hbm %s955_s21, 128  ;;  %s647_s5 = scalar_lea.hbm %s1006_s2, 256 }
  0x80   : > { %p644_p6 = scmp.ne.s32.totalorder %s955_s21, %s643_s23  ;;  %p648_p0 = scmp.lt.u32.totalorder %s955_s21, %s1006_s2 }
  0x81   : > { %p649_p7 = scmp.lt.u32.totalorder %s647_s5, %s643_s23  ;;  %p651_p10 = scmp.lt.u32.totalorder %s643_s23, %s955_s21 }
  0x82   : > { %p645_p13 = pnand %p644_p6, %p1020_p5 }
  0x83   : > { %p650_p4 = por %p649_p7, %p648_p0 }
  0x84   : > { %p646_p8 = pneg %p645_p13 }
  0x85   : > { %p652_p12 = por %p651_p10, %p650_p4 }
  0x87   : > { %p653_p1 = pnand %p652_p12, %p646_p8 }
  0x89   : > { %656 = shalt.err (!%p653_p1)
}
  0x8a   : > { %468 = dma.vmem_to_hbm [thread:$0]  (%p1020_p5), %s957_s28, 128, %s955_s21, %s279_s6  }
  0x8b PF: > { %s322_s4 = sand.u32 1, %s699_s12   ;;  %p1021_p2 = scmp.ne.s32.totalorder %s1013_s27, 0 }
  0x8c   : > { %p1022_p9 = scmp.ge.s32.totalorder %s719_s17, 2  ;;  %s323_s30 = scalar_lea.sflag [#allocation4], %s322_s4 }
  0x8e   : > { %p480_p11 = pnand %p1022_p9, %p1021_p2 }
  0x90   : > { %690 = dma.done.wait (!%p480_p11), %s323_s30, 128  }
  0x91   : > { %692 = vsyncadd (!%p480_p11), %s323_s30, 4294967168  ;;  %s332_s7 = scalar_lea.sflag [#allocation9], %s322_s4 }
  0x92   : > { %694 = dma.done.wait (!%p480_p11), %s332_s7, 128  }
  0x93   : > { %696 = vsyncadd (!%p480_p11), %s332_s7, 4294967168  ;;  %s26_s17 = sadd.s32 1, %s719_s17   ;;  %s1023_s12 = smov %s703_s13 }
  0x94   : > { %p23_p3 = scmp.ge.s32.totalorder %s26_s17, 4   ;;  %s1024_s13 = smov %s707_s14 }
  0x95   : > { %s1025_s14 = smov %s801_s26  ;;  %s1026_s15 = smov %s715_s16 }
  0x96   : > { %s1027_s16 = smov %s1029_s20  ;;  %25 = sbr.rel (!%p23_p3) target bundleno = 10 (0xa), region = 107 }
  0x9d   :  { %337 = vsyncpa [#allocation3], 1 }
  0x9e   :  { %339 = vsyncpa [#allocation3 + $0x1], 1 }
  0x9f   :  { %340 = vsyncpa [#allocation6], 1 }
  0xa0   :  { %342 = vsyncpa [#allocation6 + $0x1], 1 }
  0xa1   :  { %343 = vsyncpa [#allocation4], 1 }
  0xa2   :  { %345 = vsyncpa [#allocation4 + $0x1], 1 }
  0xa3   :  { %346 = vsyncpa [#allocation9], 1 }
  0xa4   :  { %348 = vsyncpa [#allocation9 + $0x1], 1 }

</bundles_post_ra>
